<compile_context>
chip_gen: v5e
topology: v5e:2x2
jax: 0.10.0
libtpu: 0.0.40
codegen_flags: <defaults>
</compile_context>

<pallas_src>
import functools

import jax
import jax.numpy as jnp
import numpy as np
from jax import lax
from jax.experimental import pallas as pl
from jax.experimental.pallas import tpu as pltpu

_BOX_LANES = 128                 # boxes per packed row
_ROW_LANES = 4 * _BOX_LANES      # 512 interleaved f32 lanes per packed row
_DEFAULT_CHUNK_ROWS = 256        # in-kernel compute chunk (bounds VMEM temporaries)


def _cdiv(a, b):
    return -(-a // b)


def _round_up(a, b):
    return _cdiv(a, b) * b


def _max_tile_rows_for_device():
    """Pick the DMA tile height (rows of 128 boxes) per TPU generation.

    v6e / v7x: 32 MiB scoped-VMEM default -> 2048-row tiles (~4 MiB per input
    block, ~22 MiB total with double buffering + chunked temporaries).
    Everything else (v5e's 16 MiB default, unknown chips): 512-row tiles.
    """
    try:
        kind = jax.devices()[0].device_kind.lower()
    except Exception:  # pragma: no cover - defensive
        kind = ""
    if ("v6" in kind) or ("v7" in kind) or ("7x" in kind):
        return 2048
    return 512


# ----------------------------------------------------------------------------
# Kernel helpers
# ----------------------------------------------------------------------------
def _shift_left_lanes(x, k):
    """result[..., i] = x[..., i + k] for i < W - k (wrapped tail is don't-care)."""
    return jnp.concatenate([x[..., k:], x[..., :k]], axis=-1)


def _b1iou_interleaved(p, t, eps):
    """p, t: (rows, 512) blocks of interleaved [x1,y1,x2,y2] * 128 boxes.

    Returns the per-box B1-IoU loss at lanes l with l % 4 == 0; other lanes
    hold garbage (mixes of neighbouring boxes' coordinates) and must be masked
    by the caller.
    """
    dp = _shift_left_lanes(p, 2) - p                       # l%4==0: pred w, ==1: pred h
    dt = _shift_left_lanes(t, 2) - t
    lo = jnp.maximum(p, t)                                 # l%4==0/1: intersection x1/y1
    hi = jnp.minimum(p, t)                                 # l%4==2/3: intersection x2/y2
    di = jnp.maximum(_shift_left_lanes(hi, 2) - lo, 0.0)   # l%4==0/1: iw/ih
    area_p = dp * _shift_left_lanes(dp, 1)                 # l%4==0: pred area
    area_t = dt * _shift_left_lanes(dt, 1)
    overlap = di * _shift_left_lanes(di, 1)                # l%4==0: intersection area
    union = jnp.maximum(area_p + area_t - overlap, eps)
    ious = overlap / union
    u = 1.0 - ious
    # where(iou < 0.5, 1 - iou, iou^2 - 2*iou + 1) == where(iou < 0.5, u, u*u)
    return jnp.where(ious < 0.5, u, u * u)


def _lane_iota(rows):
    return lax.broadcasted_iota(jnp.int32, (rows, _ROW_LANES), 1)


def _row_iota(rows):
    return lax.broadcasted_iota(jnp.int32, (rows, _ROW_LANES), 0)


def _selection_matrix():
    """(512, 128) f32 with S[l, j] = 1 iff l == 4*j (lane de-interleave via MXU)."""
    l = lax.broadcasted_iota(jnp.int32, (_ROW_LANES, _BOX_LANES), 0)
    j = lax.broadcasted_iota(jnp.int32, (_ROW_LANES, _BOX_LANES), 1)
    return (l == 4 * j).astype(jnp.float32)


# ----------------------------------------------------------------------------
# Kernel bodies
# ----------------------------------------------------------------------------
def _sum_kernel(pred_ref, tgt_ref, out_ref, *, eps, n_boxes, tile_rows, chunk_rows):
    """Per-tile partial sum of the masked per-box loss -> (1, 8, 512) slab."""
    base = pl.program_id(0) * (tile_rows * _ROW_LANES)  # flat f32-element offset
    nchunks = tile_rows // chunk_rows

    def body(c, acc):
        r0 = pl.multiple_of(c * chunk_rows, 8)
        p = pred_ref[pl.ds(r0, chunk_rows), :]
        t = tgt_ref[pl.ds(r0, chunk_rows), :]
        loss = _b1iou_interleaved(p, t, eps)
        lane = _lane_iota(chunk_rows)
        # Flat int32 index: fine for N < 2**29 boxes.
        elem = base + (r0 + _row_iota(chunk_rows)) * _ROW_LANES + lane
        valid = ((lane % 4) == 0) & (elem < 4 * n_boxes)
        loss = jnp.where(valid, loss, 0.0)
        return acc + loss.reshape(chunk_rows // 8, 8, _ROW_LANES).sum(axis=0)

    acc = lax.fori_loop(0, nchunks, body, jnp.zeros((8, _ROW_LANES), jnp.float32))
    out_ref[...] = acc[None]


def _wsum_kernel(pred_ref, tgt_ref, w_ref, out_ref, *, eps, n_boxes, tile_rows,
                 chunk_rows):
    """Per-tile partial sum of weight * loss -> (1, 8, 128) slab."""
    base = pl.program_id(0) * (tile_rows * _ROW_LANES)
    nchunks = tile_rows // chunk_rows
    sel = _selection_matrix()

    def body(c, acc):
        r0 = pl.multiple_of(c * chunk_rows, 8)
        p = pred_ref[pl.ds(r0, chunk_rows), :]
        t = tgt_ref[pl.ds(r0, chunk_rows), :]
        loss = _b1iou_interleaved(p, t, eps)
        lane = _lane_iota(chunk_rows)
        elem = base + (r0 + _row_iota(chunk_rows)) * _ROW_LANES + lane
        valid = ((lane % 4) == 0) & (elem < 4 * n_boxes)
        loss = jnp.where(valid, loss, 0.0)
        # compact[r, j] = loss[r, 4*j]: exact selection matmul on the idle MXU
        # (non-selected lanes were zeroed above, so no garbage can leak in).
        compact = jnp.dot(loss, sel, preferred_element_type=jnp.float32)
        lw = compact * w_ref[pl.ds(r0, chunk_rows), :]
        return acc + lw.reshape(chunk_rows // 8, 8, _BOX_LANES).sum(axis=0)

    acc = lax.fori_loop(0, nchunks, body, jnp.zeros((8, _BOX_LANES), jnp.float32))
    out_ref[...] = acc[None]


def _elems_kernel(pred_ref, tgt_ref, out_ref, *, eps, tile_rows, chunk_rows):
    """Per-box loss, written as lane-dense (tile_rows, 128) blocks."""
    nchunks = tile_rows // chunk_rows
    sel = _selection_matrix()

    def body(c, carry):
        r0 = pl.multiple_of(c * chunk_rows, 8)
        p = pred_ref[pl.ds(r0, chunk_rows), :]
        t = tgt_ref[pl.ds(r0, chunk_rows), :]
        loss = _b1iou_interleaved(p, t, eps)
        loss = jnp.where((_lane_iota(chunk_rows) % 4) == 0, loss, 0.0)
        out_ref[pl.ds(r0, chunk_rows), :] = jnp.dot(
            loss, sel, preferred_element_type=jnp.float32)
        return carry

    lax.fori_loop(0, nchunks, body, 0)


def _welems_kernel(pred_ref, tgt_ref, w_ref, out_ref, *, eps, tile_rows, chunk_rows):
    """Per-box weighted loss, lane-dense (tile_rows, 128) blocks."""
    nchunks = tile_rows // chunk_rows
    sel = _selection_matrix()

    def body(c, carry):
        r0 = pl.multiple_of(c * chunk_rows, 8)
        p = pred_ref[pl.ds(r0, chunk_rows), :]
        t = tgt_ref[pl.ds(r0, chunk_rows), :]
        loss = _b1iou_interleaved(p, t, eps)
        loss = jnp.where((_lane_iota(chunk_rows) % 4) == 0, loss, 0.0)
        compact = jnp.dot(loss, sel, preferred_element_type=jnp.float32)
        out_ref[pl.ds(r0, chunk_rows), :] = compact * w_ref[pl.ds(r0, chunk_rows), :]
        return carry

    lax.fori_loop(0, nchunks, body, 0)


# ----------------------------------------------------------------------------
# Host-side wrapper
# ----------------------------------------------------------------------------
def _as_interleaved_rows(boxes, nrows_total):
    """(N, 4) boxes -> (nrows_total, 512) rows of 128 boxes, coords interleaved.

    A pure (free) reshape when 4*N == nrows_total*512; otherwise one contiguous
    zero-pad of the flat array.  No transpose pass.
    """
    flat = boxes.astype(jnp.float32).reshape(-1)
    total = nrows_total * _ROW_LANES
    if flat.shape[0] != total:
        flat = jnp.pad(flat, (0, total - flat.shape[0]))
    return flat.reshape(nrows_total, _ROW_LANES)


def _b1iou_pallas(decode_pred, decode_target, weight, eps, want_elems,
                  max_tile_rows=None, chunk_rows=None):
    """Returns per-box weighted loss (N,) if want_elems else the weighted sum ()."""
    n = int(decode_pred.shape[0])
    nrows = _cdiv(max(n, 1), _BOX_LANES)

    if max_tile_rows is None:
        max_tile_rows = _max_tile_rows_for_device()
    chunk_rows = int(chunk_rows or _DEFAULT_CHUNK_ROWS)
    assert chunk_rows % 8 == 0

    tile_rows = min(max_tile_rows, _round_up(nrows, 8))
    chunk_rows = min(chunk_rows, tile_rows)
    tile_rows = _round_up(tile_rows, chunk_rows)
    num_tiles = _cdiv(nrows, tile_rows)
    nrows_total = num_tiles * tile_rows

    pred_rows = _as_interleaved_rows(decode_pred, nrows_total)
    tgt_rows = _as_interleaved_rows(decode_target, nrows_total)

    box_spec = pl.BlockSpec((tile_rows, _ROW_LANES), lambda i: (i, 0))
    cp_kwargs = dict(dimension_semantics=("parallel",))
    if tile_rows > 512:
        # Big-tile configuration (v6e / v7x): give the pipeline headroom above
        # the default scoped-VMEM limit.  Safe on >=64 MiB physical VMEM.
        cp_kwargs["vmem_limit_bytes"] = 40 * 1024 * 1024
    compiler_params = pltpu.CompilerParams(**cp_kwargs)

    inputs = [pred_rows, tgt_rows]
    in_specs = [box_spec, box_spec]

    has_weight = weight is not None
    if has_weight:
        w = weight.astype(jnp.float32).reshape(-1)
        pad = nrows_total * _BOX_LANES - n
        if pad:
            w = jnp.pad(w, (0, pad))
        inputs.append(w.reshape(nrows_total, _BOX_LANES))
        in_specs.append(pl.BlockSpec((tile_rows, _BOX_LANES), lambda i: (i, 0)))

    common = dict(eps=eps, tile_rows=tile_rows, chunk_rows=chunk_rows)

    if want_elems:
        kernel = _welems_kernel if has_weight else _elems_kernel
        out = pl.pallas_call(
            functools.partial(kernel, **common),
            grid=(num_tiles,),
            in_specs=in_specs,
            out_specs=pl.BlockSpec((tile_rows, _BOX_LANES), lambda i: (i, 0)),
            out_shape=jax.ShapeDtypeStruct((nrows_total, _BOX_LANES), jnp.float32),
            compiler_params=compiler_params,
        )(*inputs)
        # TODO(synk): for tiny N the cheapest option is to hand the padded
        # (nrows_total, 128) plane straight to the consumer and slice there.
        return out.reshape(nrows_total * _BOX_LANES)[:n]

    if has_weight:
        kernel = functools.partial(_wsum_kernel, n_boxes=n, **common)
        part_lanes = _BOX_LANES
    else:
        kernel = functools.partial(_sum_kernel, n_boxes=n, **common)
        part_lanes = _ROW_LANES
    partials = pl.pallas_call(
        kernel,
        grid=(num_tiles,),
        in_specs=in_specs,
        out_specs=pl.BlockSpec((1, 8, part_lanes), lambda i: (i, 0, 0)),
        out_shape=jax.ShapeDtypeStruct((num_tiles, 8, part_lanes), jnp.float32),
        compiler_params=compiler_params,
    )(*inputs)
    return jnp.sum(partials)


class B1IoULoss:
    """JAX/Pallas port of the PyTorch B1IoULoss module (forward only)."""

    def __init__(self, alpha=0.5, gamma=1.5, beta=1.0, eps=1e-6,
                 reduction='mean', loss_weight=1.0):
        self.alpha = alpha
        self.gamma = gamma
        self.beta = beta
        self.eps = eps
        self.reduction = reduction
        self.loss_weight = loss_weight

    def __call__(self, encode_decode_preds, encode_decode_targets,
                 weight=None, avg_factor=None, reduction_override=None, **kwargs):
        assert len(encode_decode_preds) == len(encode_decode_targets) == 2
        assert reduction_override in (None, 'none', 'mean', 'sum')
        reduction = reduction_override if reduction_override else self.reduction

        # TODO(synk): mmdet's data-dependent "no positive weight ->
        # (encode_pred * weight).sum()" early exit is not reproduced (it needs a
        # host-side branch on device data).

        if weight is not None and weight.ndim > 1:
            assert weight.shape == encode_decode_preds[0].shape
            weight = weight.mean(-1)

        decode_pred = encode_decode_preds[1]
        decode_target = encode_decode_targets[1]
        n = decode_pred.shape[0]

        if reduction == 'none':
            loss = _b1iou_pallas(decode_pred, decode_target, weight, self.eps,
                                 want_elems=True)
        else:
            loss_sum = _b1iou_pallas(decode_pred, decode_target, weight,
                                     self.eps, want_elems=False)
            if reduction == 'sum':
                loss = loss_sum
            else:  # 'mean'
                # TODO(synk): n == 0 with avg_factor=None divides by zero,
                # matching mmdet's behavior.
                denom = float(n) if avg_factor is None else avg_factor
                loss = loss_sum / denom
        return self.loss_weight * loss


# ----------------------------------------------------------------------------
# Pure-JAX reference + self-test
# ----------------------------------------------------------------------------
def _reference_b1iou_loss(decode_pred, decode_target, eps):
    px1, py1, px2, py2 = [decode_pred[:, i] for i in range(4)]
    tx1, ty1, tx2, ty2 = [decode_target[:, i] for i in range(4)]
    area_p = (px2 - px1) * (py2 - py1)
    area_t = (tx2 - tx1) * (ty2 - ty1)
    iw = jnp.maximum(jnp.minimum(px2, tx2) - jnp.maximum(px1, tx1), 0.0)
    ih = jnp.maximum(jnp.minimum(py2, ty2) - jnp.maximum(py1, ty1), 0.0)
    overlap = iw * ih
    union = jnp.maximum(area_p + area_t - overlap, eps)
    ious = overlap / union
    return jnp.where(ious < 0.5, 1.0 - ious, ious * ious - 2.0 * ious + 1.0)


def _make_boxes(key, n):
    k1, k2 = jax.random.split(key)
    xy = jax.random.uniform(k1, (n, 2), jnp.float32, 0.0, 10.0)
    wh = jax.random.uniform(k2, (n, 2), jnp.float32, 1.0, 5.0)
    return jnp.concatenate([xy, xy + wh], axis=-1)


if __name__ == "__main__":
    key = jax.random.PRNGKey(0)
    ks = jax.random.split(key, 10)
    N = 300  # non-multiple of 128 to exercise flat padding / in-kernel masking

    decode_pred = _make_boxes(ks[0], N)
    decode_target = _make_boxes(ks[1], N)
    # Encoded deltas (unused by the loss math, present to match the interface).
    encode_pred = jax.random.normal(ks[2], (N, 4), jnp.float32)
    encode_target = jax.random.normal(ks[3], (N, 4), jnp.float32)
    weight = jax.random.uniform(ks[4], (N,), jnp.float32, 0.0, 1.0)

    preds = (encode_pred, decode_pred)
    targets = (encode_target, decode_target)
    ref_elem = _reference_b1iou_loss(decode_pred, decode_target, 1e-6)

    # 1) mean, no weight
    loss_mean = jax.block_until_ready(B1IoULoss(reduction='mean')(preds, targets))
    np.testing.assert_allclose(np.asarray(loss_mean),
                               np.asarray(jnp.mean(ref_elem)),
                               rtol=1e-5, atol=1e-5)

    # 2) sum, weighted
    loss_sum = B1IoULoss(reduction='sum')(preds, targets, weight=weight)
    np.testing.assert_allclose(np.asarray(loss_sum),
                               np.asarray(jnp.sum(ref_elem * weight)),
                               rtol=1e-5, atol=1e-4)

    # 3) none, weighted (per-box output)
    loss_none = B1IoULoss(reduction='none')(preds, targets, weight=weight)
    np.testing.assert_allclose(np.asarray(loss_none),
                               np.asarray(ref_elem * weight),
                               rtol=1e-5, atol=1e-5)

    # 4) none, no weight
    loss_none_u = B1IoULoss(reduction='none')(preds, targets)
    np.testing.assert_allclose(np.asarray(loss_none_u), np.asarray(ref_elem),
                               rtol=1e-5, atol=1e-5)

    # 5) mean with avg_factor and loss_weight
    loss_avg = B1IoULoss(reduction='mean', loss_weight=2.0)(
        preds, targets, weight=weight, avg_factor=123.0)
    np.testing.assert_allclose(np.asarray(loss_avg),
                               np.asarray(2.0 * jnp.sum(ref_elem * weight) / 123.0),
                               rtol=1e-5, atol=1e-5)

    # 6-8) force tiny tiles/chunks to exercise the multi-tile grid and the
    # in-kernel chunk loop (the paths large N would take).
    N2 = 2500
    dp2 = _make_boxes(ks[5], N2)
    dt2 = _make_boxes(ks[6], N2)
    w2 = jax.random.uniform(ks[7], (N2,), jnp.float32, 0.0, 1.0)
    ref2 = _reference_b1iou_loss(dp2, dt2, 1e-6)

    s_unw = _b1iou_pallas(dp2, dt2, None, 1e-6, want_elems=False,
                          max_tile_rows=8, chunk_rows=8)
    np.testing.assert_allclose(np.asarray(s_unw), np.asarray(jnp.sum(ref2)),
                               rtol=1e-4, atol=1e-3)

    s_w = _b1iou_pallas(dp2, dt2, w2, 1e-6, want_elems=False,
                        max_tile_rows=16, chunk_rows=8)
    np.testing.assert_allclose(np.asarray(s_w), np.asarray(jnp.sum(ref2 * w2)),
                               rtol=1e-4, atol=1e-3)

    e_w = _b1iou_pallas(dp2, dt2, w2, 1e-6, want_elems=True,
                        max_tile_rows=16, chunk_rows=8)
    np.testing.assert_allclose(np.asarray(e_w), np.asarray(ref2 * w2),
                               rtol=1e-5, atol=1e-5)

    print("KERNEL_OK")
</pallas_src>

<mosaic_0001>
module attributes {stable_mosaic.version = 11 : i64} {
  func.func @_sum_kernel(%arg0: i32, %arg1: memref<8x512xf32, #tpu.memory_space<vmem>>, %arg2: memref<8x512xf32, #tpu.memory_space<vmem>>, %arg3: memref<1x8x512xf32, #tpu.memory_space<vmem>>) attributes {dimension_semantics = [#tpu.dimension_semantics<parallel>], iteration_bounds = array<i64: 1>, scalar_prefetch = 0 : i64, scratch_operands = 0 : i64, tpu.core_type = #tpu.core_type<tc>, window_params = [{transform_indices = @transform_0, window_bounds = array<i64: 8, 512>}, {transform_indices = @transform_1, window_bounds = array<i64: 8, 512>}, {transform_indices = @transform_2, window_bounds = array<i64: 1, 8, 512>}]} {
    %c4096_i32 = arith.constant 4096 : i32
    %0 = arith.muli %arg0, %c4096_i32 : i32
    %cst = arith.constant 0.000000e+00 : f32
    %1 = vector.broadcast %cst : f32 to vector<8x512xf32>
    %c0_i32 = arith.constant 0 : i32
    %c8_i32 = arith.constant 8 : i32
    %2 = arith.muli %c0_i32, %c8_i32 : i32
    %3 = tpu.assume_multiple %2, 8 : i32
    %4 = arith.index_cast %3 : i32 to index
    %c0 = arith.constant 0 : index
    %5 = vector.load %arg1[%4, %c0] : memref<8x512xf32, #tpu.memory_space<vmem>>, vector<8x512xf32>
    %6 = arith.index_cast %3 : i32 to index
    %c0_0 = arith.constant 0 : index
    %7 = vector.load %arg2[%6, %c0_0] : memref<8x512xf32, #tpu.memory_space<vmem>>, vector<8x512xf32>
    %8 = vector.extract_strided_slice %5 {offsets = [0, 2], sizes = [8, 510], strides = [1, 1]} : vector<8x512xf32> to vector<8x510xf32>
    %9 = vector.extract_strided_slice %5 {offsets = [0, 0], sizes = [8, 2], strides = [1, 1]} : vector<8x512xf32> to vector<8x2xf32>
    %10 = tpu.concatenate %8, %9 in 1 : vector<8x510xf32>, vector<8x2xf32> -> vector<8x512xf32>
    %11 = arith.subf %10, %5 : vector<8x512xf32>
    %12 = vector.extract_strided_slice %7 {offsets = [0, 2], sizes = [8, 510], strides = [1, 1]} : vector<8x512xf32> to vector<8x510xf32>
    %13 = vector.extract_strided_slice %7 {offsets = [0, 0], sizes = [8, 2], strides = [1, 1]} : vector<8x512xf32> to vector<8x2xf32>
    %14 = tpu.concatenate %12, %13 in 1 : vector<8x510xf32>, vector<8x2xf32> -> vector<8x512xf32>
    %15 = arith.subf %14, %7 : vector<8x512xf32>
    %16 = arith.maximumf %5, %7 : vector<8x512xf32>
    %17 = arith.minimumf %5, %7 : vector<8x512xf32>
    %18 = vector.extract_strided_slice %17 {offsets = [0, 2], sizes = [8, 510], strides = [1, 1]} : vector<8x512xf32> to vector<8x510xf32>
    %19 = vector.extract_strided_slice %17 {offsets = [0, 0], sizes = [8, 2], strides = [1, 1]} : vector<8x512xf32> to vector<8x2xf32>
    %20 = tpu.concatenate %18, %19 in 1 : vector<8x510xf32>, vector<8x2xf32> -> vector<8x512xf32>
    %21 = arith.subf %20, %16 : vector<8x512xf32>
    %cst_1 = arith.constant 0.000000e+00 : f32
    %22 = vector.broadcast %cst_1 : f32 to vector<8x512xf32>
    %23 = arith.maximumf %21, %22 : vector<8x512xf32>
    %24 = vector.extract_strided_slice %11 {offsets = [0, 1], sizes = [8, 511], strides = [1, 1]} : vector<8x512xf32> to vector<8x511xf32>
    %25 = vector.extract_strided_slice %11 {offsets = [0, 0], sizes = [8, 1], strides = [1, 1]} : vector<8x512xf32> to vector<8x1xf32>
    %26 = tpu.concatenate %24, %25 in 1 : vector<8x511xf32>, vector<8x1xf32> -> vector<8x512xf32>
    %27 = arith.mulf %11, %26 : vector<8x512xf32>
    %28 = vector.extract_strided_slice %15 {offsets = [0, 1], sizes = [8, 511], strides = [1, 1]} : vector<8x512xf32> to vector<8x511xf32>
    %29 = vector.extract_strided_slice %15 {offsets = [0, 0], sizes = [8, 1], strides = [1, 1]} : vector<8x512xf32> to vector<8x1xf32>
    %30 = tpu.concatenate %28, %29 in 1 : vector<8x511xf32>, vector<8x1xf32> -> vector<8x512xf32>
    %31 = arith.mulf %15, %30 : vector<8x512xf32>
    %32 = vector.extract_strided_slice %23 {offsets = [0, 1], sizes = [8, 511], strides = [1, 1]} : vector<8x512xf32> to vector<8x511xf32>
    %33 = vector.extract_strided_slice %23 {offsets = [0, 0], sizes = [8, 1], strides = [1, 1]} : vector<8x512xf32> to vector<8x1xf32>
    %34 = tpu.concatenate %32, %33 in 1 : vector<8x511xf32>, vector<8x1xf32> -> vector<8x512xf32>
    %35 = arith.mulf %23, %34 : vector<8x512xf32>
    %36 = arith.addf %27, %31 : vector<8x512xf32>
    %37 = arith.subf %36, %35 : vector<8x512xf32>
    %cst_2 = arith.constant 9.99999997E-7 : f32
    %38 = vector.broadcast %cst_2 : f32 to vector<8x512xf32>
    %39 = arith.maximumf %37, %38 : vector<8x512xf32>
    %40 = arith.divf %35, %39 : vector<8x512xf32>
    %cst_3 = arith.constant 1.000000e+00 : f32
    %41 = vector.broadcast %cst_3 : f32 to vector<8x512xf32>
    %42 = arith.subf %41, %40 : vector<8x512xf32>
    %cst_4 = arith.constant 5.000000e-01 : f32
    %43 = vector.broadcast %cst_4 : f32 to vector<8x512xf32>
    %44 = arith.cmpf olt, %40, %43 : vector<8x512xf32>
    %45 = arith.mulf %42, %42 : vector<8x512xf32>
    %46 = arith.select %44, %42, %45 : vector<8x512xi1>, vector<8x512xf32>
    %47 = tpu.iota {dimensions = array<i32: 1>} : vector<8x512xi32>
    %48 = tpu.iota {dimensions = array<i32: 0>} : vector<8x512xi32>
    %49 = vector.broadcast %3 : i32 to vector<8x512xi32>
    %50 = arith.addi %49, %48 : vector<8x512xi32>
    %c512_i32 = arith.constant 512 : i32
    %51 = vector.broadcast %c512_i32 : i32 to vector<8x512xi32>
    %52 = arith.muli %50, %51 : vector<8x512xi32>
    %53 = vector.broadcast %0 : i32 to vector<8x512xi32>
    %54 = arith.addi %53, %52 : vector<8x512xi32>
    %55 = arith.addi %54, %47 : vector<8x512xi32>
    %c4_i32 = arith.constant 4 : i32
    %c0_i32_5 = arith.constant 0 : i32
    %56 = arith.cmpi eq, %c4_i32, %c0_i32_5 : i32
    %c1_i32 = arith.constant 1 : i32
    %57 = arith.select %56, %c1_i32, %c4_i32 : i32
    %58 = vector.broadcast %57 : i32 to vector<8x512xi32>
    %59 = arith.remsi %47, %58 : vector<8x512xi32>
    %c0_i32_6 = arith.constant 0 : i32
    %60 = vector.broadcast %c0_i32_6 : i32 to vector<8x512xi32>
    %61 = arith.cmpi ne, %59, %60 : vector<8x512xi32>
    %c0_i32_7 = arith.constant 0 : i32
    %62 = vector.broadcast %c0_i32_7 : i32 to vector<8x512xi32>
    %63 = arith.cmpi slt, %59, %62 : vector<8x512xi32>
    %c0_i32_8 = arith.constant 0 : i32
    %64 = arith.cmpi slt, %57, %c0_i32_8 : i32
    %65 = vector.broadcast %64 : i1 to vector<8x512xi1>
    %66 = vector.broadcast %65 : vector<8x512xi1> to vector<8x512xi1>
    %67 = arith.xori %63, %66 : vector<8x512xi1>
    %68 = arith.andi %67, %61 : vector<8x512xi1>
    %69 = vector.broadcast %57 : i32 to vector<8x512xi32>
    %70 = arith.addi %59, %69 : vector<8x512xi32>
    %71 = arith.select %68, %70, %59 : vector<8x512xi1>, vector<8x512xi32>
    %c0_i32_9 = arith.constant 0 : i32
    %72 = vector.broadcast %c0_i32_9 : i32 to vector<8x512xi32>
    %73 = arith.cmpi eq, %71, %72 : vector<8x512xi32>
    %c1200_i32 = arith.constant 1200 : i32
    %74 = vector.broadcast %c1200_i32 : i32 to vector<8x512xi32>
    %75 = arith.cmpi slt, %55, %74 : vector<8x512xi32>
    %76 = arith.andi %73, %75 : vector<8x512xi1>
    %cst_10 = arith.constant 0.000000e+00 : f32
    %77 = vector.broadcast %cst_10 : f32 to vector<8x512xf32>
    %78 = arith.select %76, %46, %77 : vector<8x512xi1>, vector<8x512xf32>
    %79 = vector.shape_cast %78 : vector<8x512xf32> to vector<1x8x512xf32>
    %cst_11 = arith.constant dense<0.000000e+00> : vector<8x512xf32>
    %80 = vector.multi_reduction <add>, %79, %cst_11 [0] : vector<1x8x512xf32> to vector<8x512xf32>
    %81 = arith.addf %1, %80 : vector<8x512xf32>
    %c1_i32_12 = arith.constant 1 : i32
    %82 = vector.shape_cast %81 : vector<8x512xf32> to vector<1x8x512xf32>
    %c0_13 = arith.constant 0 : index
    %c0_14 = arith.constant 0 : index
    %c0_15 = arith.constant 0 : index
    %83 = vector.load %arg3[%c0_13, %c0_14, %c0_15] : memref<1x8x512xf32, #tpu.memory_space<vmem>>, vector<1x8x512xf32>
    tpu.vector_store %arg3[%c0_13, %c0_14, %c0_15], %82 {strides = array<i32>} : memref<1x8x512xf32, #tpu.memory_space<vmem>>, vector<1x8x512xf32>,
    return
  }
  func.func @transform_0(%arg0: i32) -> (i32, i32) {
    %c0_i32 = arith.constant 0 : i32
    %c0_i32_0 = arith.constant 0 : i32
    return %arg0, %c0_i32 : i32, i32
  }
  func.func @transform_1(%arg0: i32) -> (i32, i32) {
    %c0_i32 = arith.constant 0 : i32
    %c0_i32_0 = arith.constant 0 : i32
    return %arg0, %c0_i32 : i32, i32
  }
  func.func @transform_2(%arg0: i32) -> (i32, i32, i32) {
    %c0_i32 = arith.constant 0 : i32
    %c0_i32_0 = arith.constant 0 : i32
    %c0_i32_1 = arith.constant 0 : i32
    return %arg0, %c0_i32, %c0_i32_0 : i32, i32, i32
  }
}

</mosaic_0001>

<bundles_post_ra>
// kernel: tpu_custom_call.1
= control target key start
LH: loop header
LB: loop body
LE: loop exit
PB: predicated region body
PF: predicated region fallthrough
CT: control target
= control target key end

     0   :  { %7 = vsyncpa [#allocation3], 0  ;;  %s716_s0 = inlined_call_operand.hbm [shape: f32[8,512], index: 0, kind: input, shape index: {}]   ;;  %s717_s1 = inlined_call_operand.hbm [shape: f32[8,512], index: 1, kind: input, shape index: {}]   ;;  %s718_s2 = inlined_call_operand.hbm [shape: f32[1,8,512], index: 2, kind: output, shape index: {}]  }
   0x1   :  { %8 = vsyncpa [#allocation6], 0 }
   0x2   :  { %9 = vsyncpa [#allocation4], 0  ;;  %s15_s11 = sshll.u32 %s716_s0, 4  ;;  %s507_s12 = smov [#allocation2]   ;;  %s16_s11 = int_to_ptr.hbm [resolvable:$true] %s15_s11 }
   0x3   :  { %s17_s13 = sshll.u32 %s507_s12, 4  ;;  %s26_s16 = sshll.u32 %s717_s1, 4  ;;  %s18_s13 = int_to_ptr.vmem [resolvable:$true] %s17_s13  ;;  %s27_s16 = int_to_ptr.hbm [resolvable:$true] %s26_s16 }
   0x4   :  { %20 = dma.hbm_to_vmem [thread:$0]  %s16_s11, 512, %s18_s13, [#allocation3]  }
   0x5   :  { %s508_s17 = smov [#allocation5]  }
   0x6   :  { %s28_s18 = sshll.u32 %s508_s17, 4  ;;  %s29_s18 = int_to_ptr.vmem [resolvable:$true] %s28_s18 }
   0x7   :  { %31 = dma.hbm_to_vmem [thread:$0]  %s27_s16, 512, %s29_s18, [#allocation6]  }
   0x8   :  { %501 = dma.done.wait [#allocation3], 512  }
   0x9   :  { %502 = vsyncadd [#allocation3], 4294966784 }
   0xa   :  { %503 = dma.done.wait [#allocation6], 512  }
   0xb   :  { %504 = vsyncadd [#allocation6], 4294966784  ;;  %v533_v0 = vld [vmem:[#allocation2 + $0x10] sm:$0xff]  ;;  %v535_v1 = vld [vmem:[#allocation2] sm:$0xff]  ;;  %s509_s0 = smov 126   ;;  %vm66_vm0 = vcmask 1031168  }
   0xc   :  { %62 = vrot.lane.b32.xlu1 %v533_v0, %s509_s0  ;;  %58 = vrot.lane.b32.xlu0 %v535_v1, %s509_s0  ;;  %v539_v2 = vld [vmem:[#allocation5] sm:$0xff]  ;;  %v542_v3 = vld [vmem:[#allocation2 + $0x18] sm:$0xff]  ;;  %v544_v4 = vld [vmem:[#allocation2 + $0x8] sm:$0xff]  ;;  %s510_s1 = smov 127   ;;  %vm154_vm1 = vcmask 1039360   ;;  %s511_s19 = smov [#allocation7]  }
   0xd   :  { %84 = vrot.lane.b32.xlu2 %v539_v2, %s509_s0  ;;  %v51_v5 = vld [vmem:[#allocation5 + $0x8] sm:$0xff]  ;;  %v548_v6 = vld [vmem:[#allocation5 + $0x18] sm:$0xff]  ;;  %v52_v7 = vld [vmem:[#allocation5 + $0x10] sm:$0xff]  ;;  %v109_v8 = vmin.f32 %v535_v1, %v539_v2  ;;  %v105_v33 = vmax.f32 %v535_v1, %v539_v2  ;;  %s403_s20 = sshll.u32 %s511_s19, 4  ;;  %s405_s23 = sshll.u32 %s718_s2, 4  ;;  %s404_s20 = int_to_ptr.vmem [resolvable:$true] %s403_s20  ;;  %s406_s23 = int_to_ptr.hbm [resolvable:$true] %s405_s23 }
   0xe   :  { %v110_v9 = vmin.f32 %v544_v4, %v51_v5  ;;  %v111_v10 = vmin.f32 %v533_v0, %v52_v7  ;;  %v112_v11 = vmin.f32 %v542_v3, %v548_v6  ;;  %v106_v39 = vmax.f32 %v544_v4, %v51_v5 }
   0xf   :  { %v107_v40 = vmax.f32 %v533_v0, %v52_v7  ;;  %v108_v47 = vmax.f32 %v542_v3, %v548_v6 }
  0x14   :  { %64 = vrot.lane.b32.xlu1 %v542_v3, %s509_s0  ;;  %60 = vrot.lane.b32.xlu0 %v544_v4, %s509_s0 }
  0x15   :  { %86 = vrot.lane.b32.xlu2 %v51_v5, %s509_s0 }
  0x1c   :  { %90 = vrot.lane.b32.xlu1 %v548_v6, %s509_s0  ;;  %88 = vrot.lane.b32.xlu0 %v52_v7, %s509_s0 }
  0x1d   :  { %117 = vrot.lane.b32.xlu2 %v109_v8, %s509_s0 }
  0x24   :  { %119 = vrot.lane.b32.xlu0 %v110_v9, %s509_s0  ;;  %121 = vrot.lane.b32.xlu1 %v111_v10, %s509_s0 }
  0x25   :  { %123 = vrot.lane.b32.xlu2 %v112_v11, %s509_s0 }
  0x67   :  { %v85_v12 = vpop.permute.xlu2 %84 }
  0x6f   :  { %v87_v15 = vpop.permute.xlu2 %86 }
  0x70   :  { %v92_v25 = vsel %vm66_vm0, %v85_v12, %v87_v15 }
  0x71   :  { %v101_v30 = vsub.f32 %v92_v25, %v539_v2 }
  0x77   :  { %v118_v24 = vpop.permute.xlu2 %117 }
  0x7e   :  { %v63_v13 = vpop.permute.xlu1 %62  ;;  %v59_v14 = vpop.permute.xlu0 %58 }
  0x7f   :  { %v124_v36 = vpop.permute.xlu2 %123 }
  0x80   :  { %v133_v51 = vsel %vm66_vm0, %v124_v36, %v118_v24 }
  0x81   :  { %v137_v52 = vsub.f32 %v133_v51, %v108_v47 }
  0x83   :  { %v141_v55 = vmax.f32 %v137_v52, 0.0 }
  0x86   :  { %v65_v16 = vpop.permute.xlu1 %64  ;;  %v61_v17 = vpop.permute.xlu0 %60 }
  0x87   :  { %v69_v18 = vsel %vm66_vm0, %v63_v13, %v65_v16  ;;  %v67_v19 = vsel %vm66_vm0, %v59_v14, %v61_v17  ;;  %v68_v20 = vsel %vm66_vm0, %v61_v17, %v63_v13  ;;  %v75_v26 = vsel %vm66_vm0, %v65_v16, %v59_v14 }
  0x88   :  { %v561_v21 = vsub.f32 %v69_v18, %v533_v0  ;;  %v564_v22 = vsub.f32 %v67_v19, %v535_v1  ;;  %v567_v23 = vsub.f32 %v68_v20, %v544_v4  ;;  %v79_v31 = vsub.f32 %v75_v26, %v542_v3 }
  0x89   :  { %v306_v14 = vlaneseq }
  0x8a   :  { %148 = vrot.lane.b32.xlu1 %v567_v23, %s510_s1  ;;  %146 = vrot.lane.b32.xlu0 %v564_v22, %s510_s1 }
  0x8b   :  { %150 = vrot.lane.b32.xlu2 %v561_v21, %s510_s1 }
  0x8e   :  { %v91_v27 = vpop.permute.xlu1 %90  ;;  %v89_v28 = vpop.permute.xlu0 %88 }
  0x8f   :  { %v93_v29 = vsel %vm66_vm0, %v87_v15, %v89_v28  ;;  %v100_v34 = vsel %vm66_vm0, %v91_v27, %v85_v12  ;;  %v94_v35 = vsel %vm66_vm0, %v89_v28, %v91_v27  ;;  %v616_v28 = vand.u32 127, %v306_v14 }
  0x90   :  { %v102_v32 = vsub.f32 %v93_v29, %v51_v5  ;;  %v104_v44 = vsub.f32 %v100_v34, %v548_v6  ;;  %v103_v45 = vsub.f32 %v94_v35, %v52_v7  ;;  %v312_v29 = vshrl.u32 %v306_v14, 7 }
  0x92   :  { %172 = vrot.lane.b32.xlu1 %v101_v30, %s510_s1  ;;  %152 = vrot.lane.b32.xlu0 %v79_v31, %s510_s1 }
  0x93   :  { %174 = vrot.lane.b32.xlu2 %v102_v32, %s510_s1 }
  0x96   :  { %v120_v37 = vpop.permute.xlu0 %119  ;;  %v122_v38 = vpop.permute.xlu1 %121 }
  0x97   :  { %v125_v41 = vsel %vm66_vm0, %v118_v24, %v120_v37  ;;  %v126_v42 = vsel %vm66_vm0, %v120_v37, %v122_v38  ;;  %v127_v43 = vsel %vm66_vm0, %v122_v38, %v124_v36  ;;  %v315_v38 = vmul.u32 512, %v312_v29 }
  0x98   :  { %v134_v46 = vsub.f32 %v125_v41, %v105_v33  ;;  %v135_v49 = vsub.f32 %v126_v42, %v106_v39  ;;  %v136_v50 = vsub.f32 %v127_v43, %v107_v40  ;;  %v310_v41 = vadd.s32 384, %v616_v28 }
  0x9a   :  { %v138_v48 = vmax.f32 %v134_v46, 0.0  ;;  %178 = vrot.lane.b32.xlu1 %v104_v44, %s510_s1  ;;  %176 = vrot.lane.b32.xlu0 %v103_v45, %s510_s1  ;;  %v139_v53 = vmax.f32 %v135_v49, 0.0  ;;  %v140_v54 = vmax.f32 %v136_v50, 0.0  ;;  %v321_v47 = vadd.s32 %v315_v38, %v310_v41 }
  0x9b   :  { %v637_v49 = vadd.s32 128, %v616_v28  ;;  %v640_v50 = vadd.s32 256, %v616_v28 }
  0x9c   :  { %197 = vrot.lane.b32.xlu2 %v138_v48, %s510_s1  ;;  %vm377_vm4 = vcmp.lt.s32.totalorder %v321_v47, 1200 }
  0xa2   :  { %199 = vrot.lane.b32.xlu0 %v139_v53, %s510_s1  ;;  %201 = vrot.lane.b32.xlu1 %v140_v54, %s510_s1 }
  0xa4   :  { %203 = vrot.lane.b32.xlu2 %v141_v55, %s510_s1 }
  0xe5   :  { %v151_v56 = vpop.permute.xlu2 %150 }
  0xed   :  { %v175_v57 = vpop.permute.xlu2 %174 }
  0xf6   :  { %v198_v60 = vpop.permute.xlu2 %197 }
  0xfc   :  { %v149_v58 = vpop.permute.xlu1 %148  ;;  %v147_v59 = vpop.permute.xlu0 %146 }
  0xfd   :  { %v156_v11 = vsel %vm154_vm1, %v149_v58, %v151_v56  ;;  %v155_v12 = vsel %vm154_vm1, %v147_v59, %v149_v58  ;;  %v653_v58 = vadd.s32 %v315_v38, %v637_v49 }
  0xfe   :  { %v204_v63 = vpop.permute.xlu2 %203  ;;  %v165_v19 = vmul.f32 %v156_v11, %v567_v23  ;;  %v164_v20 = vmul.f32 %v155_v12, %v564_v22 }
  0xff   :  { %v213_v3 = vsel %vm154_vm1, %v204_v63, %v198_v60 }
 0x100   :  { %v606_v8 = vmul.f32 %v213_v3, %v141_v55  ;;  %v326_v55 = vand.u32 3, %v616_v28 }
 0x104   :  { %v173_v61 = vpop.permute.xlu1 %172  ;;  %v153_v62 = vpop.permute.xlu0 %152 }
 0x105   :  { %v163_v0 = vsel %vm154_vm1, %v153_v62, %v147_v59  ;;  %v180_v7 = vsel %vm154_vm1, %v173_v61, %v175_v57  ;;  %v157_v17 = vsel %vm154_vm1, %v151_v56, %v153_v62  ;;  %v656_v59 = vadd.s32 %v315_v38, %v640_v50 }
 0x106   :  { %v167_v5 = vmul.f32 %v163_v0, %v79_v31  ;;  %v189_v15 = vmul.f32 %v180_v7, %v101_v30  ;;  %v166_v34 = vmul.f32 %v157_v17, %v561_v21 }
 0x108   :  { %v218_v33 = vadd.f32 %v189_v15, %v164_v20 }
 0x10c   :  { %v179_v1 = vpop.permute.xlu1 %178  ;;  %v177_v2 = vpop.permute.xlu0 %176 }
 0x10d   :  { %v188_v4 = vsel %vm154_vm1, %v179_v1, %v173_v61  ;;  %v181_v10 = vsel %vm154_vm1, %v175_v57, %v177_v2  ;;  %v182_v13 = vsel %vm154_vm1, %v177_v2, %v179_v1  ;;  %v340_v61 = vand.u32 3, %v640_v50 }
 0x10e   :  { %v192_v6 = vmul.f32 %v188_v4, %v104_v44  ;;  %v190_v18 = vmul.f32 %v181_v10, %v102_v32  ;;  %v191_v25 = vmul.f32 %v182_v13, %v103_v45 }
 0x110   :  { %v221_v9 = vadd.f32 %v192_v6, %v167_v5  ;;  %v219_v32 = vadd.f32 %v190_v18, %v165_v19  ;;  %v220_v36 = vadd.f32 %v191_v25, %v166_v34 }
 0x112   :  { %v225_v16 = vsub.f32 %v221_v9, %v606_v8 }
 0x114   :  { %v229_v24 = vmax.f32 %v225_v16, 1e-06  ;;  %v200_v26 = vpop.permute.xlu0 %199  ;;  %v202_v27 = vpop.permute.xlu1 %201 }
 0x115   :  { %v205_v31 = vsel %vm154_vm1, %v198_v60, %v200_v26  ;;  %v206_v30 = vsel %vm154_vm1, %v200_v26, %v202_v27  ;;  %v207_v22 = vsel %vm154_vm1, %v202_v27, %v204_v63  ;;  %v333_v60 = vand.u32 3, %v637_v49 }
 0x116   :  { %421 = vrcp.f32 %v229_v24  ;;  %v621_v35 = vmul.f32 %v205_v31, %v138_v48  ;;  %v624_v23 = vmul.f32 %v206_v30, %v139_v53  ;;  %v626_v37 = vmul.f32 %v207_v22, %v140_v54 }
 0x117   :  { %v347_v48 = vand.u32 3, %v310_v41  ;;  %v284_v52 = vand.u32 2147483647, %v229_v24  ;;  %v286_v53 = vand.u32 2147483648, %v229_v24  ;;  %v645_v54 = vadd.s32 %v315_v38, %v616_v28 }
 0x118   :  { %v222_v39 = vsub.f32 %v218_v33, %v621_v35  ;;  %v223_v40 = vsub.f32 %v219_v32, %v624_v23  ;;  %v224_v21 = vsub.f32 %v220_v36, %v626_v37  ;;  %vm280_vm5 = vweird.f32 %v229_v24 }
 0x119   :  { %vm648_vm3 = vcmp.eq.s32.totalorder %v347_v48, 0  ;;  %vm285_vm7 = vcmp.eq.f32.partialorder %v284_v52, 8.507059e+37  ;;  %v287_v3 = vor.u32 1.1754944e-38, %v286_v53 }
 0x11a   :  { %v226_v42 = vmax.f32 %v222_v39, 1e-06  ;;  %v632_v43 = vmax.f32 %v223_v40, 1e-06  ;;  %v634_v45 = vmax.f32 %v224_v21, 1e-06  ;;  %vm676_vm15 = vmand %vm648_vm3, %vm377_vm4 }
 0x11b   :  { %vm370_vm4 = vcmp.eq.s32.totalorder %v326_v55, 0 }
 0x11c   :  { %v422_v44 = vpop.eup %421  ;;  %423 = vrcp.f32 %v226_v42  ;;  %v239_v0 = vand.u32 2147483647, %v226_v42  ;;  %v241_v1 = vand.u32 2147483648, %v226_v42  ;;  %vm235_vm8 = vweird.f32 %v226_v42 }
 0x11d   :  { %v276_v46 = vmul.f32 %v422_v44, %v229_v24  ;;  %425 = vrcp.f32 %v632_v43  ;;  %vm281_vm2 = vweird.f32 %v422_v44  ;;  %vm250_vm9 = vweird.f32 %v632_v43 }
 0x11e   :  { %427 = vrcp.f32 %v634_v45  ;;  %vm282_vm6 = vmor %vm280_vm5, %vm281_vm2  ;;  %v254_v7 = vand.u32 2147483647, %v632_v43  ;;  %v256_v11 = vand.u32 2147483648, %v632_v43  ;;  %vm665_vm10 = vcmp.eq.f32.partialorder %v239_v0, 8.507059e+37 }
 0x11f   :  { %v277_v51 = vsub.f32 1.0, %v276_v46  ;;  %v242_v15 = vor.u32 1.1754944e-38, %v241_v1  ;;  %v269_v20 = vand.u32 2147483647, %v634_v45  ;;  %v271_v25 = vand.u32 2147483648, %v634_v45 }
 0x120   :  { %vm265_vm13 = vweird.f32 %v634_v45  ;;  %vm255_vm1 = vcmp.eq.f32.partialorder %v254_v7, 8.507059e+37  ;;  %v257_v30 = vor.u32 1.1754944e-38, %v256_v11 }
 0x121   :  { %v278_v56 = vmul.f32 %v422_v44, %v277_v51  ;;  %vm270_vm5 = vcmp.eq.f32.partialorder %v269_v20, 8.507059e+37  ;;  %v272_v38 = vor.u32 1.1754944e-38, %v271_v25 }
 0x122   :  { %v424_v62 = vpop.eup %423 }
 0x123   :  { %v279_v63 = vadd.f32 %v422_v44, %v278_v56  ;;  %v426_v2 = vpop.eup %425  ;;  %v231_v4 = vmul.f32 %v424_v62, %v226_v42  ;;  %vm236_vm11 = vweird.f32 %v424_v62 }
 0x124   :  { %v428_v5 = vpop.eup %427  ;;  %v246_v6 = vmul.f32 %v426_v2, %v632_v43  ;;  %vm251_vm12 = vweird.f32 %v426_v2  ;;  %vm237_vm0 = vmor %vm235_vm8, %vm236_vm11  ;;  %vm371_vm8 = vcmp.eq.s32.totalorder %v333_v60, 0  ;;  %vm376_vm11 = vcmp.lt.s32.totalorder %v656_v59, 1200 }
 0x125   :  { %v283_v9 = vsel %vm282_vm6, %v422_v44, %v279_v63  ;;  %v232_v10 = vsub.f32 1.0, %v231_v4  ;;  %v261_v12 = vmul.f32 %v428_v5, %v634_v45  ;;  %vm266_vm14 = vweird.f32 %v428_v5  ;;  %vm252_vm2 = vmor %vm250_vm9, %vm251_vm12 }
 0x126   :  { %v288_v13 = vsel %vm285_vm7, %v287_v3, %v283_v9  ;;  %v247_v16 = vsub.f32 1.0, %v246_v6  ;;  %vm267_vm3 = vmor %vm265_vm13, %vm266_vm14  ;;  %vm374_vm7 = vcmp.lt.s32.totalorder %v645_v54, 1200  ;;  %vm375_vm9 = vcmp.lt.s32.totalorder %v653_v58, 1200 }
 0x127   :  { %v289_v17 = vmul.f32 %v288_v13, %v606_v8  ;;  %v233_v18 = vmul.f32 %v424_v62, %v232_v10  ;;  %v262_v19 = vsub.f32 1.0, %v261_v12  ;;  %vm701_vm12 = vmand %vm370_vm4, %vm374_vm7 }
 0x128   :  { %v248_v24 = vmul.f32 %v426_v2, %v247_v16  ;;  %vm705_vm14 = vmand %vm371_vm8, %vm375_vm9 }
 0x129   :  { %v293_v26 = vsub.f32 1.0, %v289_v17  ;;  %v234_v27 = vadd.f32 %v424_v62, %v233_v18  ;;  %v263_v29 = vmul.f32 %v428_v5, %v262_v19  ;;  %vm297_vm6 = vcmp.lt.f32.partialorder %v289_v17, 0.5 }
 0x12a   :  { %v249_v31 = vadd.f32 %v426_v2, %v248_v24 }
 0x12b   :  { %v301_v33 = vmul.f32 %v293_v26, %v293_v26  ;;  %v238_v34 = vsel %vm237_vm0, %v424_v62, %v234_v27  ;;  %v264_v32 = vadd.f32 %v428_v5, %v263_v29 }
 0x12c   :  { %v243_v22 = vsel %vm665_vm10, %v242_v15, %v238_v34  ;;  %v253_v36 = vsel %vm252_vm2, %v426_v2, %v249_v31  ;;  %vm372_vm10 = vcmp.eq.s32.totalorder %v340_v61, 0 }
 0x12d   :  { %v305_v39 = vsel %vm297_vm6, %v293_v26, %v301_v33  ;;  %v244_v40 = vmul.f32 %v243_v22, %v621_v35  ;;  %v258_v41 = vsel %vm255_vm1, %v257_v30, %v253_v36  ;;  %v268_v21 = vsel %vm267_vm3, %v428_v5, %v264_v32 }
 0x12e   :  { %v385_v42 = vsel %vm676_vm15, %v305_v39, 0.0  ;;  %v259_v43 = vmul.f32 %v258_v41, %v624_v23  ;;  %v273_v44 = vsel %vm270_vm5, %v272_v38, %v268_v21  ;;  %vm380_vm15 = vmand %vm372_vm10, %vm376_vm11 }
 0x12f   :  { %397 = vst [vmem:[#allocation7 + $0x18] sm:$0xff] %v385_v42  ;;  %v290_v45 = vsub.f32 1.0, %v244_v40  ;;  %v274_v35 = vmul.f32 %v273_v44, %v626_v37  ;;  %vm294_vm13 = vcmp.lt.f32.partialorder %v244_v40, 0.5 }
 0x130   :  { %v291_v28 = vsub.f32 1.0, %v259_v43  ;;  %vm295_vm0 = vcmp.lt.f32.partialorder %v259_v43, 0.5 }
 0x131   :  { %v298_v23 = vmul.f32 %v290_v45, %v290_v45  ;;  %v292_v47 = vsub.f32 1.0, %v274_v35  ;;  %vm296_vm1 = vcmp.lt.f32.partialorder %v274_v35, 0.5 }
 0x132   :  { %v299_v49 = vmul.f32 %v291_v28, %v291_v28 }
 0x133   :  { %v302_v37 = vsel %vm294_vm13, %v290_v45, %v298_v23  ;;  %v300_v50 = vmul.f32 %v292_v47, %v292_v47 }
 0x134   :  { %v382_v51 = vsel %vm701_vm12, %v302_v37, 0.0  ;;  %v303_v52 = vsel %vm295_vm0, %v291_v28, %v299_v49 }
 0x135   :  { %394 = vst [vmem:[#allocation7] sm:$0xff] %v382_v51  ;;  %v304_v53 = vsel %vm296_vm1, %v292_v47, %v300_v50  ;;  %v383_v54 = vsel %vm705_vm14, %v303_v52, 0.0 }
 0x136   :  { %v384_v55 = vsel %vm380_vm15, %v304_v53, 0.0  ;;  %395 = vst [vmem:[#allocation7 + $0x8] sm:$0xff] %v383_v54 }
 0x137   :  { %396 = vst [vmem:[#allocation7 + $0x10] sm:$0xff] %v384_v55 }
 0x138   :  { %408 = dma.vmem_to_hbm [thread:$0]  %s404_s20, 512, %s406_s23, [#allocation4]  }
 0x139   :  { %505 = dma.done.wait [#allocation4], 512  }
 0x13a   :  { %506 = vsyncadd [#allocation4], 4294966784 }
 0x13b   :  { %413 = vsyncpa [#allocation3], 1 }
 0x13c   :  { %414 = vsyncpa [#allocation6], 1 }
 0x13d   :  { %415 = vsyncpa [#allocation4], 1 }

</bundles_post_ra>
